<compile_context>
chip_gen: v7x
topology: tpu7x:2x2x1
jax: 0.10.0
libtpu: 0.0.40
codegen_flags: <defaults>
</compile_context>

<pallas_src>
import functools

import jax
import jax.numpy as jnp
from jax import lax
from jax.experimental import pallas as pl
from jax.experimental.pallas import tpu as pltpu

_LANES = 128
_SUBLANES = 8


def _round_up(n, m):
    return ((n + m - 1) // m) * m


def actor_critic_kernel(x_ref, w1_ref, b1_ref, wh_ref, bh_ref, out_ref, *,
                        num_actions):
    """One batch tile: common MLP + fused actor/critic head + masked softmax."""
    x = x_ref[...]                                            # [TB, num_inputs] (bf16)

    # common: Linear + ReLU  (hidden padded to a full 128-lane width).
    # bf16 x bf16 on the MXU, f32 accumulate; bias add + ReLU in f32.
    h = jnp.dot(x, w1_ref[...], preferred_element_type=jnp.float32) + b1_ref[...]
    h = jnp.maximum(h, 0.0)                                   # [TB, H_PAD] f32

    # fused heads: one matmul produces actor logits (cols 0..A-1) and the
    # critic value (col A); remaining lanes (up to out_w=8) are zero weights.
    z = jnp.dot(h.astype(wh_ref.dtype), wh_ref[...],
                preferred_element_type=jnp.float32) + bh_ref[...]   # [TB, out_w] f32

    col = lax.broadcasted_iota(jnp.int32, z.shape, 1)         # lane index
    action_mask = col < num_actions

    # numerically stable softmax restricted to the real action lanes
    # (finite sentinel; exact reciprocal so rows sum to 1 for Categorical use).
    logits = jnp.where(action_mask, z, -1e30)
    m = jnp.max(logits, axis=-1, keepdims=True)
    e = jnp.where(action_mask, jnp.exp(logits - m), 0.0)
    inv_denom = pl.reciprocal(jnp.sum(e, axis=-1, keepdims=True))
    probs = e * inv_denom                                     # zeros outside actions

    # value lane: raw linear output at column `num_actions`
    value_lane = jnp.where(col == num_actions, z, 0.0)

    # single store of the packed narrow [TB, out_w] slab
    out_ref[...] = (probs + value_lane).astype(out_ref.dtype)


def actor_critic_forward(x, packed, num_actions, *, block_batch=8192):
    """x: [batch, num_inputs]. packed: padded/fused params (see pack_params).

    Returns (probs [batch, num_actions], value [batch, 1]), both float32."""
    batch, num_inputs = x.shape
    w1, b1, wh, bh = packed["w1"], packed["b1"], packed["wh"], packed["bh"]
    h_pad = w1.shape[1]
    out_w = wh.shape[1]

    # --- batch tiling: minimal padding, fat tiles, >=2 steps when possible ---
    b8 = _round_up(batch, _SUBLANES)
    n_tiles = max(-(-b8 // block_batch), 2 if b8 >= 2 * _SUBLANES else 1)
    tb = _round_up(-(-b8 // n_tiles), _SUBLANES)
    n_tiles = -(-b8 // tb)
    b_pad = tb * n_tiles

    x = x.astype(w1.dtype)
    if b_pad != batch:
        x = jnp.pad(x, ((0, b_pad - batch), (0, 0)))

    # advisory cost estimate for the XLA scheduler around this custom call
    flops = 2 * b_pad * (num_inputs * h_pad + h_pad * out_w)
    transcendentals = b_pad * out_w
    bytes_accessed = (x.size * x.dtype.itemsize
                      + b_pad * out_w * 4
                      + w1.size * w1.dtype.itemsize
                      + wh.size * wh.dtype.itemsize
                      + b1.size * 4 + bh.size * 4)
    cost = pl.CostEstimate(flops=flops, transcendentals=transcendentals,
                           bytes_accessed=bytes_accessed)

    kernel = functools.partial(actor_critic_kernel, num_actions=num_actions)
    out = pl.pallas_call(
        kernel,
        out_shape=jax.ShapeDtypeStruct((b_pad, out_w), jnp.float32),
        grid=(n_tiles,),
        in_specs=[
            pl.BlockSpec((tb, num_inputs), lambda i: (i, 0)),     # x: tiled over batch
            pl.BlockSpec((num_inputs, h_pad), lambda i: (0, 0)),  # w1: resident
            pl.BlockSpec((1, h_pad), lambda i: (0, 0)),           # b1: resident
            pl.BlockSpec((h_pad, out_w), lambda i: (0, 0)),       # fused head W
            pl.BlockSpec((1, out_w), lambda i: (0, 0)),           # fused head b
        ],
        out_specs=pl.BlockSpec((tb, out_w), lambda i: (i, 0)),
        compiler_params=pltpu.CompilerParams(
            dimension_semantics=("parallel",)),
        cost_estimate=cost,
    )(x, w1, b1, wh, bh)

    # slice the narrow packed slab back apart (padded rows/lanes never used)
    probs = out[:batch, :num_actions]
    value = out[:batch, num_actions:num_actions + 1]
    return probs, value


def init_params_raw(key, num_inputs, num_actions, hidden_size):
    """PyTorch nn.Linear default init (uniform +/- 1/sqrt(fan_in)); weights
    stored transposed as [in, out]."""
    ks = jax.random.split(key, 6)

    def lin(kw, kb, fan_in, fan_out):
        bound = 1.0 / jnp.sqrt(jnp.float32(fan_in))
        w = jax.random.uniform(kw, (fan_in, fan_out), jnp.float32, -bound, bound)
        b = jax.random.uniform(kb, (1, fan_out), jnp.float32, -bound, bound)
        return w, b

    w1, b1 = lin(ks[0], ks[1], num_inputs, hidden_size)
    wa, ba = lin(ks[2], ks[3], hidden_size, num_actions)
    wc, bc = lin(ks[4], ks[5], hidden_size, 1)
    return {"w1": w1, "b1": b1, "wa": wa, "ba": ba, "wc": wc, "bc": bc}


def pack_params(raw, num_inputs, num_actions, hidden_size,
                param_dtype=jnp.bfloat16):
    """Pad hidden to 128 lanes, fuse actor+critic weights into one
    [hidden_pad, out_w] operand (out_w = round_up(num_actions+1, 8)), and cast
    the matmul operands to bf16 (MXU-native); biases stay f32."""
    h_pad = _round_up(hidden_size, _LANES)
    out_w = _round_up(num_actions + 1, _SUBLANES)

    w1 = jnp.zeros((num_inputs, h_pad), jnp.float32).at[:, :hidden_size].set(raw["w1"])
    b1 = jnp.zeros((1, h_pad), jnp.float32).at[:, :hidden_size].set(raw["b1"])

    wh = jnp.zeros((h_pad, out_w), jnp.float32)
    wh = wh.at[:hidden_size, :num_actions].set(raw["wa"])
    wh = wh.at[:hidden_size, num_actions:num_actions + 1].set(raw["wc"])

    bh = jnp.zeros((1, out_w), jnp.float32)
    bh = bh.at[:, :num_actions].set(raw["ba"])
    bh = bh.at[:, num_actions:num_actions + 1].set(raw["bc"])

    return {"w1": w1.astype(param_dtype), "b1": b1,
            "wh": wh.astype(param_dtype), "bh": bh}


def _reference_forward(x, raw):
    """Pure-JAX f32 reference matching the PyTorch module."""
    h = jnp.maximum(x @ raw["w1"] + raw["b1"], 0.0)
    logits = h @ raw["wa"] + raw["ba"]
    probs = jax.nn.softmax(logits, axis=-1)
    value = h @ raw["wc"] + raw["bc"]
    return probs, value


if __name__ == "__main__":
    # LunarLander-like small shapes
    batch, num_inputs, num_actions, hidden_size = 2, 8, 4, 32

    key = jax.random.PRNGKey(0)
    k_x, k_p = jax.random.split(key)
    x = jax.random.normal(k_x, (batch, num_inputs), jnp.float32)
    raw = init_params_raw(k_p, num_inputs, num_actions, hidden_size)
    packed = pack_params(raw, num_inputs, num_actions, hidden_size)

    probs, value = actor_critic_forward(x, packed, num_actions)
    jax.block_until_ready((probs, value))

    # sanity: shapes match the PyTorch module, softmax rows sum to 1 (exact
    # reciprocal), and outputs match the f32 reference within bf16 tolerance.
    assert probs.shape == (batch, num_actions)
    assert value.shape == (batch, 1)
    assert jnp.allclose(jnp.sum(probs, axis=-1), 1.0, atol=1e-3)

    ref_probs, ref_value = _reference_forward(x, raw)
    assert jnp.allclose(probs, ref_probs, atol=2e-2)
    assert jnp.allclose(value, ref_value, atol=2e-2)

    print("KERNEL_OK")
</pallas_src>

<mosaic_0001>
module attributes {stable_mosaic.version = 11 : i64} {
  func.func @actor_critic_kernel(%arg0: i32, %arg1: memref<8x8xbf16, #tpu.memory_space<vmem>>, %arg2: memref<8x128xbf16, #tpu.memory_space<vmem>>, %arg3: memref<1x128xf32, #tpu.memory_space<vmem>>, %arg4: memref<128x8xbf16, #tpu.memory_space<vmem>>, %arg5: memref<1x8xf32, #tpu.memory_space<vmem>>, %arg6: memref<8x8xf32, #tpu.memory_space<vmem>>) attributes {dimension_semantics = [#tpu.dimension_semantics<parallel>], iteration_bounds = array<i64: 1>, scalar_prefetch = 0 : i64, scratch_operands = 0 : i64, tpu.core_type = #tpu.core_type<tc>, window_params = [{transform_indices = @transform_0, window_bounds = array<i64: 8, 8>}, {pipeline_mode = #tpu.pipeline_mode<synchronous>, transform_indices = @transform_1, window_bounds = array<i64: 8, 128>}, {pipeline_mode = #tpu.pipeline_mode<synchronous>, transform_indices = @transform_2, window_bounds = array<i64: 1, 128>}, {pipeline_mode = #tpu.pipeline_mode<synchronous>, transform_indices = @transform_3, window_bounds = array<i64: 128, 8>}, {pipeline_mode = #tpu.pipeline_mode<synchronous>, transform_indices = @transform_4, window_bounds = array<i64: 1, 8>}, {transform_indices = @transform_5, window_bounds = array<i64: 8, 8>}]} {
    %c0 = arith.constant 0 : index
    %c0_0 = arith.constant 0 : index
    %0 = vector.load %arg1[%c0, %c0_0] : memref<8x8xbf16, #tpu.memory_space<vmem>>, vector<8x8xbf16>
    %c0_1 = arith.constant 0 : index
    %c0_2 = arith.constant 0 : index
    %1 = vector.load %arg2[%c0_1, %c0_2] : memref<8x128xbf16, #tpu.memory_space<vmem>>, vector<8x128xbf16>
    %cst = arith.constant dense<0.000000e+00> : vector<8x128xf32>
    %2 = tpu.matmul %0, %1, %cst {dimension_numbers = #tpu.dot_dimension_numbers<[1], [0], [0], [1], [0, 0, 1, 1], [], []>} : vector<8x8xbf16>, vector<8x128xbf16>, vector<8x128xf32> -> vector<8x128xf32>
    %c0_3 = arith.constant 0 : index
    %c0_4 = arith.constant 0 : index
    %3 = vector.load %arg3[%c0_3, %c0_4] : memref<1x128xf32, #tpu.memory_space<vmem>>, vector<1x128xf32>
    %4 = vector.broadcast %3 : vector<1x128xf32> to vector<8x128xf32>
    %5 = arith.addf %2, %4 : vector<8x128xf32>
    %cst_5 = arith.constant 0.000000e+00 : f32
    %6 = vector.broadcast %cst_5 : f32 to vector<8x128xf32>
    %7 = arith.maximumf %5, %6 : vector<8x128xf32>
    %8 = arith.truncf %7 : vector<8x128xf32> to vector<8x128xbf16>
    %c0_6 = arith.constant 0 : index
    %c0_7 = arith.constant 0 : index
    %9 = vector.load %arg4[%c0_6, %c0_7] : memref<128x8xbf16, #tpu.memory_space<vmem>>, vector<128x8xbf16>
    %cst_8 = arith.constant dense<0.000000e+00> : vector<8x8xf32>
    %10 = tpu.matmul %8, %9, %cst_8 {dimension_numbers = #tpu.dot_dimension_numbers<[1], [0], [0], [1], [0, 0, 1, 1], [], []>} : vector<8x128xbf16>, vector<128x8xbf16>, vector<8x8xf32> -> vector<8x8xf32>
    %c0_9 = arith.constant 0 : index
    %c0_10 = arith.constant 0 : index
    %11 = vector.load %arg5[%c0_9, %c0_10] : memref<1x8xf32, #tpu.memory_space<vmem>>, vector<1x8xf32>
    %12 = vector.broadcast %11 : vector<1x8xf32> to vector<8x8xf32>
    %13 = arith.addf %10, %12 : vector<8x8xf32>
    %14 = tpu.iota {dimensions = array<i32: 1>} : vector<8x8xi32>
    %c4_i32 = arith.constant 4 : i32
    %15 = vector.broadcast %c4_i32 : i32 to vector<8x8xi32>
    %16 = arith.cmpi slt, %14, %15 : vector<8x8xi32>
    %cst_11 = arith.constant -1.000000e+30 : f32
    %17 = vector.broadcast %cst_11 : f32 to vector<8x8xf32>
    %18 = arith.select %16, %13, %17 : vector<8x8xi1>, vector<8x8xf32>
    %cst_12 = arith.constant dense<0xFF800000> : vector<8xf32>
    %19 = vector.multi_reduction <maximumf>, %18, %cst_12 [1] : vector<8x8xf32> to vector<8xf32>
    %20 = vector.shape_cast %19 : vector<8xf32> to vector<8x1xf32>
    %21 = vector.broadcast %20 : vector<8x1xf32> to vector<8x8xf32>
    %22 = arith.subf %18, %21 : vector<8x8xf32>
    %23 = math.exp %22 : vector<8x8xf32>
    %cst_13 = arith.constant 0.000000e+00 : f32
    %24 = vector.broadcast %cst_13 : f32 to vector<8x8xf32>
    %25 = arith.select %16, %23, %24 : vector<8x8xi1>, vector<8x8xf32>
    %cst_14 = arith.constant dense<0.000000e+00> : vector<8xf32>
    %26 = vector.multi_reduction <add>, %25, %cst_14 [1] : vector<8x8xf32> to vector<8xf32>
    %27 = vector.shape_cast %26 : vector<8xf32> to vector<8x1xf32>
    %28 = tpu.reciprocal %27 : vector<8x1xf32> -> vector<8x1xf32>
    %29 = vector.broadcast %28 : vector<8x1xf32> to vector<8x8xf32>
    %30 = arith.mulf %25, %29 : vector<8x8xf32>
    %c4_i32_15 = arith.constant 4 : i32
    %31 = vector.broadcast %c4_i32_15 : i32 to vector<8x8xi32>
    %32 = arith.cmpi eq, %14, %31 : vector<8x8xi32>
    %cst_16 = arith.constant 0.000000e+00 : f32
    %33 = vector.broadcast %cst_16 : f32 to vector<8x8xf32>
    %34 = arith.select %32, %13, %33 : vector<8x8xi1>, vector<8x8xf32>
    %35 = arith.addf %30, %34 : vector<8x8xf32>
    %c0_17 = arith.constant 0 : index
    %c0_18 = arith.constant 0 : index
    %36 = vector.load %arg6[%c0_17, %c0_18] : memref<8x8xf32, #tpu.memory_space<vmem>>, vector<8x8xf32>
    tpu.vector_store %arg6[%c0_17, %c0_18], %35 {strides = array<i32>} : memref<8x8xf32, #tpu.memory_space<vmem>>, vector<8x8xf32>,
    return
  }
  func.func @transform_0(%arg0: i32) -> (i32, i32) {
    %c0_i32 = arith.constant 0 : i32
    %c0_i32_0 = arith.constant 0 : i32
    return %arg0, %c0_i32 : i32, i32
  }
  func.func @transform_1(%arg0: i32) -> (i32, i32) {
    %c0_i32 = arith.constant 0 : i32
    %c0_i32_0 = arith.constant 0 : i32
    %c0_i32_1 = arith.constant 0 : i32
    return %c0_i32, %c0_i32_0 : i32, i32
  }
  func.func @transform_2(%arg0: i32) -> (i32, i32) {
    %c0_i32 = arith.constant 0 : i32
    %c0_i32_0 = arith.constant 0 : i32
    %c0_i32_1 = arith.constant 0 : i32
    return %c0_i32, %c0_i32_0 : i32, i32
  }
  func.func @transform_3(%arg0: i32) -> (i32, i32) {
    %c0_i32 = arith.constant 0 : i32
    %c0_i32_0 = arith.constant 0 : i32
    %c0_i32_1 = arith.constant 0 : i32
    return %c0_i32, %c0_i32_0 : i32, i32
  }
  func.func @transform_4(%arg0: i32) -> (i32, i32) {
    %c0_i32 = arith.constant 0 : i32
    %c0_i32_0 = arith.constant 0 : i32
    %c0_i32_1 = arith.constant 0 : i32
    return %c0_i32, %c0_i32_0 : i32, i32
  }
  func.func @transform_5(%arg0: i32) -> (i32, i32) {
    %c0_i32 = arith.constant 0 : i32
    %c0_i32_0 = arith.constant 0 : i32
    return %arg0, %c0_i32 : i32, i32
  }
}

</mosaic_0001>

<bundles_post_ra>
// kernel: tpu_custom_call.1
= control target key start
LH: loop header
LB: loop body
LE: loop exit
PB: predicated region body
PF: predicated region fallthrough
CT: control target
= control target key end

     0   :  { %vm35_vm0 = vcmask 1043456   ;;  %vm31_vm1 = vcmask 64512   ;;  %v313_v1 = vmov 0.0   ;;  %vm314_vm2 = vmmov 0   ;;  %s398_s0 = inlined_call_operand.vmem [shape: bf16[8,8], index: 0, kind: input, shape index: {}]   ;;  %s399_s1 = inlined_call_operand.vmem [shape: bf16[8,128], index: 1, kind: input, shape index: {}]   ;;  %s400_s2 = inlined_call_operand.vmem [shape: f32[1,128], index: 2, kind: input, shape index: {}]   ;;  %s401_s3 = inlined_call_operand.vmem [shape: bf16[128,8], index: 3, kind: input, shape index: {}]   ;;  %s402_s4 = inlined_call_operand.vmem [shape: f32[1,8], index: 4, kind: input, shape index: {}]   ;;  %s403_s5 = inlined_call_operand.hbm [shape: f32[8,8], index: 5, kind: output, shape index: {}]  }
   0x1   :  { %v23_v0 = vld [vmem:[%s399_s1] sm:$0xf]  ;;  %248 = vmatprep.subr.bf16.mxu0 %v313_v1  ;;  %250 = vmatprep.mubr.msk.bf16.mxu0 %vm314_vm2, %v313_v1  ;;  %v278_v5 = vld [vmem:[%s401_s3 + $0x8] sm:$0xff]   ;;  %v279_v6 = vld [vmem:[%s401_s3 + $0x10] sm:$0xff]  }
   0x2   :  { %v37_v2 = vsel %vm35_vm0, %v23_v0, 0  ;;  %v22_v3 = vld [vmem:[%s398_s0] sm:$0xf]  ;;  %254 = vmatprep.subr.bf16.mxu1 %v313_v1  ;;  %270 = vmatprep.mubr.msk.bf16.mxu1 %vm314_vm2, %v313_v1 }
   0x3   :  { %v277_v4 = vld [vmem:[%s401_s3] sm:$0xff]   ;;  %249 = vmatpush3.bf16.msra.mxu0 %v37_v2 }
   0x4   :  { %255 = vmatpush3.bf16.msra.mxu1 %v277_v4 }
   0x5   :  { %256 = vmatprep.subr.bf16.mxu1 %v313_v1 }
   0x6   :  { %251 = vmatmul.mubr.msk.bf16.vlgmr.msra.gmra.mrb[0].mxu0 %vm31_vm1, %v22_v3 }
   0x8   :  { %257 = vmatpush3.bf16.msra.mxu1 %v278_v5 }
   0x9   :  { %258 = vmatprep.subr.bf16.mxu1 %v313_v1 }
   0xa   :  { %10 = vsyncpa [#allocation3], 0  ;;  %v280_v7 = vld [vmem:[%s401_s3 + $0x18] sm:$0xff]   ;;  %v281_v8 = vld [vmem:[%s401_s3 + $0x20] sm:$0xff]   ;;  %v192_v20 = vlaneseq }
   0xb   :  { %v282_v9 = vld [vmem:[%s401_s3 + $0x28] sm:$0xff]   ;;  %v283_v10 = vld [vmem:[%s401_s3 + $0x30] sm:$0xff]   ;;  %v284_v11 = vld [vmem:[%s401_s3 + $0x38] sm:$0xff]  }
   0xc   :  { %259 = vmatpush3.bf16.msra.mxu1 %v279_v6  ;;  %v226_v12 = vld [vmem:[%s400_s2] ss:$0 sm:$0xff]  ;;  %v193_v21 = vand.u32 127, %v192_v20  ;;  %s315_s2 = smov [#allocation2]  }
   0xd   :  { %260 = vmatprep.subr.bf16.mxu1 %v313_v1  ;;  %v228_v22 = vld [vmem:[%s402_s4] ss:$0 sm:$0xff]  ;;  %s218_s3 = sshll.u32 %s315_s2, 4  ;;  %s219_s3 = int_to_ptr.vmem [resolvable:$true] %s218_s3 }
   0xe   :  { %vm208_vm3 = vcmp.eq.s32.totalorder %v193_v21, 4  ;;  %vm194_vm4 = vcmp.lt.s32.totalorder %v193_v21, 4  ;;  %s289_s4 = scalar_lea.vmem %s219_s3, 128  ;;  %p294_p1 = scmp.lt.s32.totalorder %s219_s3, %s219_s3 }
   0xf   :  { %p290_p0 = scmp.ne.s32.totalorder %s219_s3, %s289_s4  ;;  %p295_p2 = scmp.lt.s32.totalorder %s289_s4, %s289_s4 }
  0x10   :  { %261 = vmatpush3.bf16.msra.mxu1 %v280_v7 }
  0x11   :  { %262 = vmatprep.subr.bf16.mxu1 %v313_v1  ;;  %p296_p3 = por %p295_p2, %p294_p1 }
  0x13   :  { %p297_p4 = pnand %p296_p3, %p290_p0 }
  0x14   :  { %263 = vmatpush3.bf16.msra.mxu1 %v281_v8 }
  0x15   :  { %264 = vmatprep.subr.bf16.mxu1 %v313_v1 }
  0x18   :  { %265 = vmatpush3.bf16.msra.mxu1 %v282_v9 }
  0x19   :  { %266 = vmatprep.subr.bf16.mxu1 %v313_v1 }
  0x1c   :  { %267 = vmatpush3.bf16.msra.mxu1 %v283_v10 }
  0x1d   :  { %268 = vmatprep.subr.bf16.mxu1 %v313_v1 }
  0x20   :  { %269 = vmatpush3.bf16.msra.mxu1 %v284_v11 }
  0xd9   :  { %v73_v13 = vpop.f32.mrb[0].mxu0 }
  0xda   :  { %v74_v14 = vadd.f32 %v226_v12, %v73_v13  ;;  %v252_v15 = vpop.f32.mrb[1].mxu0 }
  0xdb   :  { %v76_v16 = vpop.f32.mrb[2].mxu0 }
  0xdc   :  { %v79_v17 = vmax.f32 %v74_v14, 0.0  ;;  %v253_v18 = vpop.f32.mrb[3].mxu0 }
  0xde   :  { %v80_v19 = vpack.c.bf16 %v79_v17, %v79_v17 }
  0xe0   :  { %271 = vmatmul.mubr.bf16.vlgmr.msra.gmra.mrb[0].mxu1 %v80_v19 }
 0x1b3   :  { %v186_v23 = vpop.f32.mrb[0].mxu1 }
 0x1b4   :  { %v187_v24 = vadd.f32 %v228_v22, %v186_v23  ;;  %v272_v25 = vpop.f32.mrb[1].mxu1 }
 0x1b5   :  { %v189_v26 = vpop.f32.mrb[2].mxu1 }
 0x1b6   :  { %v209_v27 = vsel %vm208_vm3, %v187_v24, 0.0  ;;  %v273_v28 = vpop.f32.mrb[3].mxu1  ;;  %v195_v29 = vsel %vm194_vm4, %v187_v24, -1e+30 }
 0x1b7   :  { %v196_v30 = vsel %vm31_vm1, %v195_v29, -inf }
 0x1b8   :  { %197 = vmax.xlane.f32.xlu0 %v196_v30 }
 0x245   :  { %v198_v31 = vpop.xlane.xlu0 %197 }
 0x246   :  { %v199_v32 = vsub.f32 %v195_v29, %v198_v31 }
 0x248   :  { %v200_v33 = vmul.f32 1.442695, %v199_v32 }
 0x24a   :  { %285 = vpow2.f32 %v200_v33 }
 0x254   :  { %v286_v34 = vpop.eup %285 }
 0x255   :  { %v202_v35 = vsel %vm194_vm4, %v286_v34, 0.0 }
 0x256   :  { %v203_v36 = vsel %vm31_vm1, %v202_v35, 0.0 }
 0x257   :  { %204 = vadd.xlane.f32.xlu0 %v203_v36 }
 0x2e4   :  { %v205_v37 = vpop.xlane.xlu0 %204 }
 0x2e5   :  { %287 = vrcp.f32 %v205_v37 }
 0x2ef   :  { %v288_v38 = vpop.eup %287 }
 0x2f0   :  { %v207_v39 = vmul.f32 %v288_v38, %v202_v35 }
 0x2f2   :  { %v210_v40 = vadd.f32 %v209_v27, %v207_v39 }
 0x2f4   :  { %211 = vst.msk [vmem:[#allocation2] sm:$0xff] %vm31_vm1, %v210_v40 }
 0x2f5   :  { %300 = shalt.err (!%p297_p4)
}
 0x2f6   :  { %s301_s17 = scalar_lea.hbm %s403_s5, 128 }
 0x2f7   :  { %p302_p5 = scmp.ne.s32.totalorder %s403_s5, %s301_s17  ;;  %p305_p6 = scmp.lt.u32.totalorder %s301_s17, %s403_s5 }
 0x2f9   :  { %p307_p7 = pnand %p305_p6, %p302_p5 }
 0x2fb   :  { %310 = shalt.err (!%p307_p7)
}
 0x2fc   :  { %221 = dma.vmem_to_hbm [thread:$0]  %s219_s3, 128, %s403_s5, [#allocation3]  }
 0x2fd   :  { %311 = dma.done.wait [#allocation3], 128  }
 0x2fe   :  { %312 = vsyncadd [#allocation3], 4294967168 }
 0x2ff   :  { %225 = vsyncpa [#allocation3], 1 }

</bundles_post_ra>
